<compile_context>
chip_gen: v7x
topology: tpu7x:2x2x1
jax: 0.10.0
libtpu: 0.0.40
codegen_flags: <defaults>
</compile_context>

<pallas_src>
import math
from functools import partial

import jax
import jax.numpy as jnp
from jax.experimental import pallas as pl
from jax.experimental.pallas import tpu as pltpu  # noqa: F401  (TPU backend)


def _round_up(x, m):
    return (x + m - 1) // m * m


# ----------------------------- fused Pallas kernel ----------------------------

def _fused_proj_kernel(xt_ref, wq_ref, bq_ref, xi_ref, wk_ref, bk_ref,
                       q_ref, k_ref):
    # Q projection: (B*n_tok, T_hidden) @ (T_hidden, d_q_pad) + bias, f32 accumulation.
    q_ref[...] = (
        jnp.dot(xt_ref[...], wq_ref[...], preferred_element_type=jnp.float32)
        + bq_ref[...]
    )
    # K projection: (B*n_roi, I_hidden) @ (I_hidden, all_head_size) + bias.
    k_ref[...] = (
        jnp.dot(xi_ref[...], wk_ref[...], preferred_element_type=jnp.float32)
        + bk_ref[...]
    )


def fused_projections(encT, encI, Wq, bq, Wk, bk):
    """Both Linear projections in one pallas_call (no grid: whole problem in VMEM).

    encT: (B, n_tok, T_hidden), encI: (B, n_roi, I_hidden)
    Wq: (T_hidden, 300), bq: (1, 300), Wk: (I_hidden, all_head), bk: (1, all_head)
    returns Q: (B, n_tok, 300) f32, K: (B, n_roi, all_head) f32
    """
    B, n_tok, t_hidden = encT.shape
    _, n_roi, i_hidden = encI.shape
    d_q = Wq.shape[1]
    d_k = Wk.shape[1]
    d_q_pad = _round_up(d_q, 128)   # lane-dense output slab: 300 -> 384

    # Pad Q weights/bias to a multiple of 128 lanes; cast matmul operands to bf16,
    # keep biases in f32 (elementwise adds stay f32 for v5e VPU).
    wq_p = jnp.pad(Wq, ((0, 0), (0, d_q_pad - d_q))).astype(jnp.bfloat16)
    bq_p = jnp.pad(bq, ((0, 0), (0, d_q_pad - d_q)))
    wk_b = Wk.astype(jnp.bfloat16)

    xt = encT.reshape(B * n_tok, t_hidden).astype(jnp.bfloat16)   # taller M for MXU
    xi = encI.reshape(B * n_roi, i_hidden).astype(jnp.bfloat16)

    q_pad, k = pl.pallas_call(
        _fused_proj_kernel,
        out_shape=(
            jax.ShapeDtypeStruct((B * n_tok, d_q_pad), jnp.float32),
            jax.ShapeDtypeStruct((B * n_roi, d_k), jnp.float32),
        ),
        # No grid / BlockSpecs: the whole (tiny) working set lives in VMEM and the
        # kernel executes once. Total footprint is a few tens of KiB, far below the
        # scoped VMEM limit on v5e/v6e/v7x.
    )(xt, wq_p, bq_p, xi, wk_b, bk)

    Q = q_pad[:, :d_q].reshape(B, n_tok, d_q)
    K = k.reshape(B, n_roi, d_k)
    return Q, K


# ------------------------------ module wrapper --------------------------------

def init_params(key, t_hidden, i_hidden, heads=1):
    """Deterministic synthetic parameter init (mirrors NMTGrounding.__init__ shapes)."""
    projection = i_hidden // 2
    head_size = projection // heads
    all_head_size = heads * head_size
    k1, k2, k3, k4 = jax.random.split(key, 4)
    params = {
        "Wq": 0.02 * jax.random.normal(k1, (t_hidden, 300), jnp.float32),            # self.Q
        "bq": 0.02 * jax.random.normal(k2, (1, 300), jnp.float32),
        "Wk": 0.02 * jax.random.normal(k3, (i_hidden, all_head_size), jnp.float32),  # self.K
        "bk": 0.02 * jax.random.normal(k4, (1, all_head_size), jnp.float32),
    }
    return params, head_size


@partial(jax.jit, static_argnums=(4,))
def nmt_grounding_forward(params, encT, encI, mask, attention_head_size):
    B, n_roi, _ = encI.shape
    _, n_tok, _ = encT.shape

    # Hot-path matmuls: single fused Pallas kernel (one launch for Q and K).
    Q, K = fused_projections(encT, encI, params["Wq"], params["bq"],
                             params["Wk"], params["bk"])

    # remapping_word_feature is identity in the reference.

    # TODO(synk): the UpTreeLSTM/DownTreeLSTM traversal + SingleScore/PairScore scoring
    # over pickled dependency parse trees is data-dependent Python recursion with no
    # clean Pallas equivalent; as in the reference code path shown, `logits` keeps its
    # Q.new_zeros initialization before the scale + mask step.
    #
    # zeros / sqrt(attention_head_size) + mask == broadcast(mask), so the previous
    # scale-of-zeros kernel is dead compute; emit the broadcast directly in XLA.
    del attention_head_size  # only scales the (all-zero) logits on this code path
    logits = jnp.broadcast_to(mask.astype(jnp.float32), (B, n_tok, n_roi))

    out = jnp.squeeze(logits)   # matches `logits.squeeze()`
    return out, Q, K


# ----------------------------------- main --------------------------------------

if __name__ == "__main__":
    key = jax.random.PRNGKey(0)
    B, n_tok, n_roi = 2, 8, 4
    t_hidden, i_hidden = 32, 64           # cfgT.hidden_size, cfgI.hidden_size

    kp, k1, k2, k3 = jax.random.split(key, 4)
    params, head_size = init_params(kp, t_hidden, i_hidden, heads=1)

    encT = jax.random.normal(k1, (B, n_tok, t_hidden), jnp.float32)
    encI = jax.random.normal(k2, (B, n_roi, i_hidden), jnp.float32)
    # additive attention mask over RoIs: 0 for keep, -1e9 for masked
    mask = jnp.where(jax.random.uniform(k3, (B, 1, n_roi)) > 0.8, -1e9, 0.0).astype(jnp.float32)

    logits, Q, K = nmt_grounding_forward(params, encT, encI, mask, head_size)
    jax.block_until_ready((logits, Q, K))

    assert logits.shape == (B, n_tok, n_roi)
    assert Q.shape == (B, n_tok, 300)
    assert K.shape == (B, n_roi, i_hidden // 2)
    # logits must equal the broadcast mask (zero logits path)
    assert bool(jnp.allclose(logits, jnp.broadcast_to(mask, (B, n_tok, n_roi))))
    print("KERNEL_OK")
</pallas_src>

<mosaic_0001>
module attributes {stable_mosaic.version = 11 : i64} {
  func.func @_fused_proj_kernel(%arg0: memref<16x32xbf16, #tpu.memory_space<vmem>>, %arg1: memref<32x384xbf16, #tpu.memory_space<vmem>>, %arg2: memref<1x384xf32, #tpu.memory_space<vmem>>, %arg3: memref<8x64xbf16, #tpu.memory_space<vmem>>, %arg4: memref<64x32xbf16, #tpu.memory_space<vmem>>, %arg5: memref<1x32xf32, #tpu.memory_space<vmem>>, %arg6: memref<16x384xf32, #tpu.memory_space<vmem>>, %arg7: memref<8x32xf32, #tpu.memory_space<vmem>>) attributes {dimension_semantics = [], scalar_prefetch = 0 : i64, scratch_operands = 0 : i64, tpu.core_type = #tpu.core_type<tc>} {
    %c0 = arith.constant 0 : index
    %c0_0 = arith.constant 0 : index
    %0 = vector.load %arg0[%c0, %c0_0] : memref<16x32xbf16, #tpu.memory_space<vmem>>, vector<16x32xbf16>
    %c0_1 = arith.constant 0 : index
    %c0_2 = arith.constant 0 : index
    %1 = vector.load %arg1[%c0_1, %c0_2] : memref<32x384xbf16, #tpu.memory_space<vmem>>, vector<32x384xbf16>
    %cst = arith.constant dense<0.000000e+00> : vector<16x384xf32>
    %2 = tpu.matmul %0, %1, %cst {dimension_numbers = #tpu.dot_dimension_numbers<[1], [0], [0], [1], [0, 0, 1, 1], [], []>} : vector<16x32xbf16>, vector<32x384xbf16>, vector<16x384xf32> -> vector<16x384xf32>
    %c0_3 = arith.constant 0 : index
    %c0_4 = arith.constant 0 : index
    %3 = vector.load %arg2[%c0_3, %c0_4] : memref<1x384xf32, #tpu.memory_space<vmem>>, vector<1x384xf32>
    %4 = vector.broadcast %3 : vector<1x384xf32> to vector<16x384xf32>
    %5 = arith.addf %2, %4 : vector<16x384xf32>
    %c0_5 = arith.constant 0 : index
    %c0_6 = arith.constant 0 : index
    %6 = vector.load %arg6[%c0_5, %c0_6] : memref<16x384xf32, #tpu.memory_space<vmem>>, vector<16x384xf32>
    tpu.vector_store %arg6[%c0_5, %c0_6], %5 {strides = array<i32>} : memref<16x384xf32, #tpu.memory_space<vmem>>, vector<16x384xf32>,
    %c0_7 = arith.constant 0 : index
    %c0_8 = arith.constant 0 : index
    %7 = vector.load %arg3[%c0_7, %c0_8] : memref<8x64xbf16, #tpu.memory_space<vmem>>, vector<8x64xbf16>
    %c0_9 = arith.constant 0 : index
    %c0_10 = arith.constant 0 : index
    %8 = vector.load %arg4[%c0_9, %c0_10] : memref<64x32xbf16, #tpu.memory_space<vmem>>, vector<64x32xbf16>
    %cst_11 = arith.constant dense<0.000000e+00> : vector<8x32xf32>
    %9 = tpu.matmul %7, %8, %cst_11 {dimension_numbers = #tpu.dot_dimension_numbers<[1], [0], [0], [1], [0, 0, 1, 1], [], []>} : vector<8x64xbf16>, vector<64x32xbf16>, vector<8x32xf32> -> vector<8x32xf32>
    %c0_12 = arith.constant 0 : index
    %c0_13 = arith.constant 0 : index
    %10 = vector.load %arg5[%c0_12, %c0_13] : memref<1x32xf32, #tpu.memory_space<vmem>>, vector<1x32xf32>
    %11 = vector.broadcast %10 : vector<1x32xf32> to vector<8x32xf32>
    %12 = arith.addf %9, %11 : vector<8x32xf32>
    %c0_14 = arith.constant 0 : index
    %c0_15 = arith.constant 0 : index
    %13 = vector.load %arg7[%c0_14, %c0_15] : memref<8x32xf32, #tpu.memory_space<vmem>>, vector<8x32xf32>
    tpu.vector_store %arg7[%c0_14, %c0_15], %12 {strides = array<i32>} : memref<8x32xf32, #tpu.memory_space<vmem>>, vector<8x32xf32>,
    return
  }
}

</mosaic_0001>

<bundles_post_ra>
// kernel: nmt_grounding_forward.1
= control target key start
LH: loop header
LB: loop body
LE: loop exit
PB: predicated region body
PF: predicated region fallthrough
CT: control target
= control target key end

     0   :  { %v372_v1 = vmov 0.0   ;;  %v373_v3 = vmov 0   ;;  %vm374_vm0 = vmmov 0   ;;  %vm91_vm1 = vcmask 261120   ;;  %s493_s0 = inlined_call_operand.vmem [shape: bf16[16,32], index: 0, kind: input, shape index: {}]   ;;  %s494_s1 = inlined_call_operand.vmem [shape: bf16[32,384], index: 1, kind: input, shape index: {}]   ;;  %s495_s2 = inlined_call_operand.vmem [shape: f32[1,384], index: 2, kind: input, shape index: {}]   ;;  %s496_s3 = inlined_call_operand.vmem [shape: bf16[8,64], index: 3, kind: input, shape index: {}]   ;;  %s497_s4 = inlined_call_operand.vmem [shape: bf16[64,32], index: 4, kind: input, shape index: {}]   ;;  %s498_s5 = inlined_call_operand.vmem [shape: f32[1,32], index: 5, kind: input, shape index: {}]   ;;  %s499_s6 = inlined_call_operand.vmem [shape: f32[16,384], index: 6, kind: output, shape index: {0}]   ;;  %s500_s7 = inlined_call_operand.hbm [shape: f32[8,32], index: 7, kind: output, shape index: {1}]  }
   0x1   :  { %v335_v0 = vld [vmem:[%s494_s1 + $0x4] ss:$12 sps:$4 sm:$0xff]   ;;  %319 = vmatprep.subr.bf16.mxu0 %v372_v1  ;;  %127 = vmatprep.mubr.bf16.mxu1 %v373_v3  ;;  %v338_v4 = vld [vmem:[%s494_s1] ss:$12 sps:$4 sm:$0xff]   ;;  %v339_v5 = vld [vmem:[%s494_s1 + $0x1c] ss:$12 sps:$4 sm:$0xff]  }
   0x2   :  { %v337_v2 = vld [vmem:[%s497_s4] sm:$0xff]   ;;  %95 = vmatprep.subr.bf16.mxu1 %v335_v0  ;;  %327 = vmatprep.mubr.msk.bf16.mxu0 %vm374_vm0, %v372_v1  ;;  %v341_v6 = vld [vmem:[%s497_s4 + $0x8] sm:$0xff]   ;;  %v344_v9 = vld [vmem:[%s497_s4 + $0x10] sm:$0xff]  }
   0x3   :  { %320 = vmatpush3.bf16.msra.mxu0 %v337_v2  ;;  %96 = vmatpush1.bf16.msra.mxu1 %v338_v4  ;;  %v342_v7 = vld [vmem:[%s494_s1 + $0x18] ss:$12 sps:$4 sm:$0xff]   ;;  %v345_v10 = vld [vmem:[%s494_s1 + $0x8] ss:$12 sps:$4 sm:$0xff]  }
   0x4   :  { %321 = vmatprep.subr.bf16.mxu0 %v372_v1  ;;  %97 = vmatprep.subr.bf16.mxu1 %v339_v5  ;;  %v343_v8 = vld [vmem:[%s493_s0] sm:$0xff]  }
   0x7   :  { %322 = vmatpush3.bf16.msra.mxu0 %v341_v6  ;;  %98 = vmatpush1.bf16.msra.mxu1 %v342_v7 }
   0x8   :  { %323 = vmatprep.subr.bf16.mxu0 %v372_v1  ;;  %311 = vmatprep.subr.bf16.mxu1 %v372_v1 }
   0x9   :  { %13 = vsyncpa [#allocation3], 0  ;;  %v346_v11 = vld [vmem:[%s497_s4 + $0x18] sm:$0xff]   ;;  %v347_v12 = vld [vmem:[%s494_s1 + $0x20] ss:$12 sps:$4 sm:$0xff]   ;;  %vm225_vm2 = vcmask 523264   ;;  %v39_v14 = vlaneseq }
   0xa   :  { %295 = vmatmul.mubr.msk.bf16.vlgmr.msra.gmra.mrb[0].mxu1 %vm91_vm1, %v343_v8  ;;  %v185_v13 = vld [vmem:[%s496_s3] sm:$0xf]  ;;  %s375_s30 = smov [#allocation2]  }
   0xb   :  { %324 = vmatpush3.bf16.msra.mxu0 %v344_v9  ;;  %312 = vmatpush3.bf16.msra.mxu1 %v345_v10  ;;  %v40_v15 = vshrl.u32 %v39_v14, 7  ;;  %v37_v17 = vld [vmem:[%s495_s2] sm:$0x7]  ;;  %s278_s8 = sshll.u32 %s375_s30, 4  ;;  %s279_s8 = int_to_ptr.vmem [resolvable:$true] %s278_s8 }
   0xc   :  { %325 = vmatprep.subr.bf16.mxu0 %v372_v1  ;;  %313 = vmatprep.subr.bf16.mxu1 %v372_v1  ;;  %v297_v30 = vld [vmem:[%s498_s5] ss:$0 sm:$0xff]  ;;  %s348_s12 = scalar_lea.vmem %s279_s8, 128  ;;  %p353_p1 = scmp.lt.s32.totalorder %s279_s8, %s279_s8 }
   0xd   :  { %315 = vmatprep.mubr.msk.bf16.mxu1 %vm374_vm0, %v372_v1  ;;  %v41_v16 = vsub.s32 0, %v40_v15  ;;  %v45_v18 = vsub.s32 1, %v40_v15  ;;  %v49_v24 = vsub.s32 2, %v40_v15  ;;  %p349_p0 = scmp.ne.s32.totalorder %s279_s8, %s348_s12  ;;  %p354_p2 = scmp.lt.s32.totalorder %s348_s12, %s348_s12 }
   0xf   :  { %326 = vmatpush3.bf16.msra.mxu0 %v346_v11  ;;  %314 = vmatpush3.bf16.msra.mxu1 %v347_v12  ;;  %v42_v19 = vrot.slane %v37_v17, %v41_v16  ;;  %v46_v20 = vrot.slane %v37_v17, %v45_v18  ;;  %v50_v31 = vrot.slane %v37_v17, %v49_v24  ;;  %p355_p3 = por %p354_p2, %p353_p1 }
  0x11   :  { %p356_p4 = pnand %p355_p3, %p349_p0 }
  0x12   :  { %328 = vmatmul.mubr.msk.bf16.vlgmr.msra.gmra.mrb[0].mxu0 %vm225_vm2, %v185_v13  ;;  %316 = vmatmul.mubr.msk.bf16.vlgmr.msra.gmra.mrb[4].mxu1 %vm91_vm1, %v343_v8 }
  0xdd   :  { %v129_v21 = vpop.f32.mrb[0].mxu1 }
  0xde   :  { %v130_v22 = vadd.f32 %v129_v21, %v42_v19  ;;  %v131_v23 = vpop.f32.mrb[1].mxu1 }
  0xdf   :  { %v132_v25 = vadd.f32 %v131_v23, %v46_v20  ;;  %v133_v26 = vpop.f32.mrb[2].mxu1 }
  0xe0   :  { %179 = vst [vmem:[%s499_s6] sm:$0xff] %v130_v22  ;;  %v134_v27 = vadd.f32 %v133_v26, %v42_v19  ;;  %v135_v28 = vpop.f32.mrb[3].mxu1 }
  0xe1   :  { %180 = vst [vmem:[%s499_s6 + $0x8] sm:$0xff] %v132_v25  ;;  %v136_v29 = vadd.f32 %v135_v28, %v46_v20 }
  0xe2   :  { %182 = vst [vmem:[%s499_s6 + $0x18] sm:$0xff] %v134_v27 }
  0xe3   :  { %183 = vst [vmem:[%s499_s6 + $0x20] sm:$0xff] %v136_v29 }
  0xe5   :  { %v263_v32 = vpop.f32.mrb[0].mxu0  ;;  %v172_v34 = vpop.f32.mrb[4].mxu1 }
  0xe6   :  { %v264_v33 = vadd.f32 %v297_v30, %v263_v32  ;;  %v329_v35 = vpop.f32.mrb[1].mxu0  ;;  %v173_v36 = vadd.f32 %v172_v34, %v50_v31  ;;  %v317_v37 = vpop.f32.mrb[5].mxu1 }
  0xe7   :  { %v266_v38 = vpop.f32.mrb[2].mxu0  ;;  %v175_v39 = vpop.f32.mrb[6].mxu1 }
  0xe8   :  { %269 = vst.msk [vmem:[#allocation2] sm:$0xff] %vm91_vm1, %v264_v33  ;;  %v330_v40 = vpop.f32.mrb[3].mxu0  ;;  %181 = vst [vmem:[%s499_s6 + $0x10] sm:$0xff] %v173_v36  ;;  %v176_v41 = vadd.f32 %v175_v39, %v50_v31  ;;  %v318_v42 = vpop.f32.mrb[7].mxu1 }
  0xe9   :  { %359 = shalt.err (!%p356_p4)
}
  0xea   :  { %s360_s15 = scalar_lea.hbm %s500_s7, 128 }
  0xeb   :  { %p361_p5 = scmp.ne.s32.totalorder %s500_s7, %s360_s15  ;;  %p364_p6 = scmp.lt.u32.totalorder %s360_s15, %s500_s7 }
  0xed   :  { %p366_p7 = pnand %p364_p6, %p361_p5 }
  0xef   :  { %369 = shalt.err (!%p366_p7)
}
  0xf0   :  { %281 = dma.vmem_to_hbm [thread:$0]  %s279_s8, 128, %s500_s7, [#allocation3]   ;;  %184 = vst [vmem:[%s499_s6 + $0x28] sm:$0xff] %v176_v41 }
  0xf1   :  { %370 = dma.done.wait [#allocation3], 128  }
  0xf2   :  { %371 = vsyncadd [#allocation3], 4294967168 }
  0xf3   :  { %287 = vsyncpa [#allocation3], 1 }

</bundles_post_ra>
